<compile_context>
chip_gen: v5e
topology: v5e:2x2
jax: 0.10.0
libtpu: 0.0.40
codegen_flags: <defaults>
</compile_context>

<pallas_src>
import jax
import jax.numpy as jnp
from jax.experimental import pallas as pl
from jax.experimental.pallas import tpu as pltpu

_LANE = 128  # vreg lane width / MXU column granularity


def _round_up(n, m):
    return ((n + m - 1) // m) * m


def _sublane_pack(dtype):
    # rows per packed sublane group: f32 -> 8, bf16 -> 16, int8/fp8 -> 32
    return 8 * (4 // jnp.dtype(dtype).itemsize)


def _mlp_kernel(x_ref, w1_ref, b1_ref, w2_ref, b2_ref, w3_ref, b3_ref, o_ref):
    # Cast x to the MXU input dtype in-register (x stays f32 in HBM).
    x = x_ref[...].astype(w1_ref.dtype)
    # fc1 + ReLU : MXU matmul, f32 accumulation; bias/ReLU on the VPU in f32.
    h1 = jnp.dot(x, w1_ref[...], preferred_element_type=jnp.float32)
    h1 = jnp.maximum(h1 + b1_ref[...], 0.0)
    # fc2 + ReLU (cast activations to the MXU input dtype only for the matmul).
    h2 = jnp.dot(h1.astype(w2_ref.dtype), w2_ref[...],
                 preferred_element_type=jnp.float32)
    h2 = jnp.maximum(h2 + b2_ref[...], 0.0)
    # fc3 (no activation), narrow out_dim columns written directly.
    out = jnp.dot(h2.astype(w3_ref.dtype), w3_ref[...],
                  preferred_element_type=jnp.float32) + b3_ref[...]
    o_ref[...] = out.astype(o_ref.dtype)


def prepare_params(params, compute_dtype=jnp.bfloat16):
    """Pad the hidden dim to a lane multiple and cast weights ONCE.

    Call this once per parameter update and reuse the result across forward
    calls. obs_dim (fc1's K) and out_dim (fc3's N) are intentionally NOT
    padded. Biases stay f32 (added to the f32 accumulator in-kernel).
    """
    w1, b1 = params["w1"], params["b1"]
    w2, b2 = params["w2"], params["b2"]
    w3, b3 = params["w3"], params["b3"]
    obs_dim, hid = w1.shape
    out_dim = w3.shape[1]
    hid_p = _round_up(hid, _LANE)

    def padw(w, rows, cols):
        return jnp.pad(
            w, ((0, rows - w.shape[0]), (0, cols - w.shape[1]))
        ).astype(compute_dtype)

    return dict(
        w1=padw(w1, obs_dim, hid_p),      # K = obs_dim stays unpadded
        w2=padw(w2, hid_p, hid_p),
        w3=padw(w3, hid_p, out_dim),      # N = out_dim stays unpadded
        b1=jnp.pad(b1, (0, hid_p - hid)).reshape(1, hid_p).astype(jnp.float32),
        b2=jnp.pad(b2, (0, hid_p - hid)).reshape(1, hid_p).astype(jnp.float32),
        b3=b3.reshape(1, out_dim).astype(jnp.float32),
    )


def value_network_forward(x, prepared, *, tile_b=512):
    """x: (B, obs_dim) f32; prepared: output of prepare_params()."""
    w1, b1 = prepared["w1"], prepared["b1"]
    w2, b2 = prepared["w2"], prepared["b2"]
    w3, b3 = prepared["w3"], prepared["b3"]

    B, obs_dim = x.shape
    assert obs_dim == w1.shape[0], "x feature dim must match fc1 fan_in"
    hid_p = w1.shape[1]
    out_dim = w3.shape[1]
    compute_dtype = w1.dtype
    pack = _sublane_pack(compute_dtype)   # 8 for f32, 16 for bf16

    # Batch tile: big (mem-bound => fewer grid steps), rounded to the packing.
    tile_b = max(pack, min(int(tile_b), _round_up(B, pack)))
    tile_b = _round_up(tile_b, pack)
    b_p = _round_up(B, tile_b)

    # Ensure >= 2 grid steps so v7x can shard the parallel batch axis across
    # both TensorCores; the extra step is negligible on v5e/v6e.
    if b_p // tile_b == 1 and tile_b > pack:
        tile_b = _round_up(-(-tile_b // 2), pack)
        b_p = _round_up(B, tile_b)

    grid = (b_p // tile_b,)

    # Only batch-pad x, and only when actually needed (zero rows -> exact math).
    if b_p != B:
        x = jnp.pad(x, ((0, b_p - B), (0, 0)))

    # Weights/biases: VMEM-resident across the grid (same block every step).
    resident = lambda a: pl.BlockSpec(a.shape, lambda i: (0,) * a.ndim)

    flops = 2 * b_p * (obs_dim * hid_p + hid_p * hid_p + hid_p * out_dim)
    bytes_accessed = (
        x.size * x.dtype.itemsize
        + sum(a.size * a.dtype.itemsize for a in (w1, b1, w2, b2, w3, b3))
        + b_p * out_dim * 4
    )

    out_padded = pl.pallas_call(
        _mlp_kernel,
        out_shape=jax.ShapeDtypeStruct((b_p, out_dim), jnp.float32),
        grid=grid,
        in_specs=[
            pl.BlockSpec((tile_b, obs_dim), lambda i: (i, 0)),  # x: batch-tiled, K unpadded
            resident(w1), resident(b1),
            resident(w2), resident(b2),
            resident(w3), resident(b3),
        ],
        out_specs=pl.BlockSpec((tile_b, out_dim), lambda i: (i, 0)),  # narrow writeback
        compiler_params=pltpu.CompilerParams(
            dimension_semantics=("parallel",),  # megacore sharding on v7x
        ),
        cost_estimate=pl.CostEstimate(
            flops=flops, transcendentals=0, bytes_accessed=bytes_accessed),
    )(x, w1, b1, w2, b2, w3, b3)

    return out_padded[:B]


def init_params(key, obs_dim, hidden_size, output_dim):
    """Mimics nn.Linear default init: uniform(-1/sqrt(fan_in), 1/sqrt(fan_in))."""
    ks = jax.random.split(key, 6)

    def lin(kw, kb, fan_in, fan_out):
        bound = 1.0 / jnp.sqrt(fan_in)
        w = jax.random.uniform(kw, (fan_in, fan_out), jnp.float32, -bound, bound)
        b = jax.random.uniform(kb, (fan_out,), jnp.float32, -bound, bound)
        return w, b

    w1, b1 = lin(ks[0], ks[1], obs_dim, hidden_size)
    w2, b2 = lin(ks[2], ks[3], hidden_size, hidden_size)
    w3, b3 = lin(ks[4], ks[5], hidden_size, output_dim)
    return dict(w1=w1, b1=b1, w2=w2, b2=b2, w3=w3, b3=b3)


def reference_forward(x, p):
    h1 = jnp.maximum(x @ p["w1"] + p["b1"], 0.0)
    h2 = jnp.maximum(h1 @ p["w2"] + p["b2"], 0.0)
    return h2 @ p["w3"] + p["b3"]


if __name__ == "__main__":
    obs_dim, hidden_size, output_dim = 16, 32, 1

    key = jax.random.PRNGKey(0)
    k_params, k_x, k_x2 = jax.random.split(key, 3)
    params = init_params(k_params, obs_dim, hidden_size, output_dim)

    # ---- small batch (B=8) ----
    x = jax.random.normal(k_x, (8, obs_dim), jnp.float32)
    ref = reference_forward(x, params)

    # f32 MXU-input path: zero-padding keeps real outputs exact.
    prep_f32 = prepare_params(params, compute_dtype=jnp.float32)
    out_f32 = jax.block_until_ready(value_network_forward(x, prep_f32))
    assert out_f32.shape == (8, output_dim)
    assert jnp.allclose(out_f32, ref, atol=1e-5, rtol=1e-5), "f32 mismatch vs reference"

    # Default bf16 MXU-input path (f32 accumulation, f32 bias/ReLU epilogue).
    # Tolerance checked at hidden=32; widen / re-validate for much larger hidden.
    prep_bf16 = prepare_params(params)  # compute_dtype=bf16 by default
    out_bf16 = jax.block_until_ready(value_network_forward(x, prep_bf16))
    assert out_bf16.shape == (8, output_dim)
    assert jnp.all(jnp.isfinite(out_bf16))
    assert jnp.max(jnp.abs(out_bf16 - ref)) < 5e-2, "bf16 path diverged from reference"

    # ---- larger batch: exercises multi-step grid + batch-tail padding ----
    x2 = jax.random.normal(k_x2, (300, obs_dim), jnp.float32)
    ref2 = reference_forward(x2, params)
    out2 = jax.block_until_ready(value_network_forward(x2, prep_bf16))
    assert out2.shape == (300, output_dim)
    assert jnp.max(jnp.abs(out2 - ref2)) < 5e-2, "bf16 multi-tile path diverged"

    print("KERNEL_OK")
</pallas_src>

<mosaic_0001>
module attributes {stable_mosaic.version = 11 : i64} {
  func.func @_mlp_kernel(%arg0: i32, %arg1: memref<8x16xf32, #tpu.memory_space<vmem>>, %arg2: memref<16x128xf32, #tpu.memory_space<vmem>>, %arg3: memref<1x128xf32, #tpu.memory_space<vmem>>, %arg4: memref<128x128xf32, #tpu.memory_space<vmem>>, %arg5: memref<1x128xf32, #tpu.memory_space<vmem>>, %arg6: memref<128x1xf32, #tpu.memory_space<vmem>>, %arg7: memref<1x1xf32, #tpu.memory_space<vmem>>, %arg8: memref<8x1xf32, #tpu.memory_space<vmem>>) attributes {dimension_semantics = [#tpu.dimension_semantics<parallel>], iteration_bounds = array<i64: 1>, scalar_prefetch = 0 : i64, scratch_operands = 0 : i64, tpu.core_type = #tpu.core_type<tc>, window_params = [{transform_indices = @transform_0, window_bounds = array<i64: 8, 16>}, {pipeline_mode = #tpu.pipeline_mode<synchronous>, transform_indices = @transform_1, window_bounds = array<i64: 16, 128>}, {pipeline_mode = #tpu.pipeline_mode<synchronous>, transform_indices = @transform_2, window_bounds = array<i64: 1, 128>}, {pipeline_mode = #tpu.pipeline_mode<synchronous>, transform_indices = @transform_3, window_bounds = array<i64: 128, 128>}, {pipeline_mode = #tpu.pipeline_mode<synchronous>, transform_indices = @transform_4, window_bounds = array<i64: 1, 128>}, {pipeline_mode = #tpu.pipeline_mode<synchronous>, transform_indices = @transform_5, window_bounds = array<i64: 128, 1>}, {pipeline_mode = #tpu.pipeline_mode<synchronous>, transform_indices = @transform_6, window_bounds = array<i64: 1, 1>}, {transform_indices = @transform_7, window_bounds = array<i64: 8, 1>}]} {
    %c0 = arith.constant 0 : index
    %c0_0 = arith.constant 0 : index
    %0 = vector.load %arg1[%c0, %c0_0] : memref<8x16xf32, #tpu.memory_space<vmem>>, vector<8x16xf32>
    %c0_1 = arith.constant 0 : index
    %c0_2 = arith.constant 0 : index
    %1 = vector.load %arg2[%c0_1, %c0_2] : memref<16x128xf32, #tpu.memory_space<vmem>>, vector<16x128xf32>
    %cst = arith.constant dense<0.000000e+00> : vector<8x128xf32>
    %2 = tpu.matmul %0, %1, %cst {dimension_numbers = #tpu.dot_dimension_numbers<[1], [0], [0], [1], [0, 0, 1, 1], [], []>} : vector<8x16xf32>, vector<16x128xf32>, vector<8x128xf32> -> vector<8x128xf32>
    %c0_3 = arith.constant 0 : index
    %c0_4 = arith.constant 0 : index
    %3 = vector.load %arg3[%c0_3, %c0_4] : memref<1x128xf32, #tpu.memory_space<vmem>>, vector<1x128xf32>
    %4 = vector.broadcast %3 : vector<1x128xf32> to vector<8x128xf32>
    %5 = arith.addf %2, %4 : vector<8x128xf32>
    %cst_5 = arith.constant 0.000000e+00 : f32
    %6 = vector.broadcast %cst_5 : f32 to vector<8x128xf32>
    %7 = arith.maximumf %5, %6 : vector<8x128xf32>
    %c0_6 = arith.constant 0 : index
    %c0_7 = arith.constant 0 : index
    %8 = vector.load %arg4[%c0_6, %c0_7] : memref<128x128xf32, #tpu.memory_space<vmem>>, vector<128x128xf32>
    %cst_8 = arith.constant dense<0.000000e+00> : vector<8x128xf32>
    %9 = tpu.matmul %7, %8, %cst_8 {dimension_numbers = #tpu.dot_dimension_numbers<[1], [0], [0], [1], [0, 0, 1, 1], [], []>} : vector<8x128xf32>, vector<128x128xf32>, vector<8x128xf32> -> vector<8x128xf32>
    %c0_9 = arith.constant 0 : index
    %c0_10 = arith.constant 0 : index
    %10 = vector.load %arg5[%c0_9, %c0_10] : memref<1x128xf32, #tpu.memory_space<vmem>>, vector<1x128xf32>
    %11 = vector.broadcast %10 : vector<1x128xf32> to vector<8x128xf32>
    %12 = arith.addf %9, %11 : vector<8x128xf32>
    %cst_11 = arith.constant 0.000000e+00 : f32
    %13 = vector.broadcast %cst_11 : f32 to vector<8x128xf32>
    %14 = arith.maximumf %12, %13 : vector<8x128xf32>
    %c0_12 = arith.constant 0 : index
    %c0_13 = arith.constant 0 : index
    %15 = vector.load %arg6[%c0_12, %c0_13] : memref<128x1xf32, #tpu.memory_space<vmem>>, vector<128x1xf32>
    %cst_14 = arith.constant dense<0.000000e+00> : vector<8x1xf32>
    %16 = tpu.matmul %14, %15, %cst_14 {dimension_numbers = #tpu.dot_dimension_numbers<[1], [0], [0], [1], [0, 0, 1, 1], [], []>} : vector<8x128xf32>, vector<128x1xf32>, vector<8x1xf32> -> vector<8x1xf32>
    %c0_15 = arith.constant 0 : index
    %c0_16 = arith.constant 0 : index
    %17 = vector.load %arg7[%c0_15, %c0_16] : memref<1x1xf32, #tpu.memory_space<vmem>>, vector<1x1xf32>
    %18 = vector.broadcast %17 : vector<1x1xf32> to vector<8x1xf32>
    %19 = arith.addf %16, %18 : vector<8x1xf32>
    %c0_17 = arith.constant 0 : index
    %c0_18 = arith.constant 0 : index
    %20 = vector.load %arg8[%c0_17, %c0_18] : memref<8x1xf32, #tpu.memory_space<vmem>>, vector<8x1xf32>
    tpu.vector_store %arg8[%c0_17, %c0_18], %19 {strides = array<i32>} : memref<8x1xf32, #tpu.memory_space<vmem>>, vector<8x1xf32>,
    return
  }
  func.func @transform_0(%arg0: i32) -> (i32, i32) {
    %c0_i32 = arith.constant 0 : i32
    %c0_i32_0 = arith.constant 0 : i32
    return %arg0, %c0_i32 : i32, i32
  }
  func.func @transform_1(%arg0: i32) -> (i32, i32) {
    %c0_i32 = arith.constant 0 : i32
    %c0_i32_0 = arith.constant 0 : i32
    %c0_i32_1 = arith.constant 0 : i32
    return %c0_i32, %c0_i32_0 : i32, i32
  }
  func.func @transform_2(%arg0: i32) -> (i32, i32) {
    %c0_i32 = arith.constant 0 : i32
    %c0_i32_0 = arith.constant 0 : i32
    %c0_i32_1 = arith.constant 0 : i32
    return %c0_i32, %c0_i32_0 : i32, i32
  }
  func.func @transform_3(%arg0: i32) -> (i32, i32) {
    %c0_i32 = arith.constant 0 : i32
    %c0_i32_0 = arith.constant 0 : i32
    %c0_i32_1 = arith.constant 0 : i32
    return %c0_i32, %c0_i32_0 : i32, i32
  }
  func.func @transform_4(%arg0: i32) -> (i32, i32) {
    %c0_i32 = arith.constant 0 : i32
    %c0_i32_0 = arith.constant 0 : i32
    %c0_i32_1 = arith.constant 0 : i32
    return %c0_i32, %c0_i32_0 : i32, i32
  }
  func.func @transform_5(%arg0: i32) -> (i32, i32) {
    %c0_i32 = arith.constant 0 : i32
    %c0_i32_0 = arith.constant 0 : i32
    %c0_i32_1 = arith.constant 0 : i32
    return %c0_i32, %c0_i32_0 : i32, i32
  }
  func.func @transform_6(%arg0: i32) -> (i32, i32) {
    %c0_i32 = arith.constant 0 : i32
    %c0_i32_0 = arith.constant 0 : i32
    %c0_i32_1 = arith.constant 0 : i32
    return %c0_i32, %c0_i32_0 : i32, i32
  }
  func.func @transform_7(%arg0: i32) -> (i32, i32) {
    %c0_i32 = arith.constant 0 : i32
    %c0_i32_0 = arith.constant 0 : i32
    return %arg0, %c0_i32 : i32, i32
  }
}

</mosaic_0001>

<bundles_post_ra>
// kernel: tpu_custom_call.1
= control target key start
LH: loop header
LB: loop body
LE: loop exit
PB: predicated region body
PF: predicated region fallthrough
CT: control target
= control target key end

     0   :  { %s397_s0 = inlined_call_operand.hbm [shape: f32[8,16], index: 0, kind: input, shape index: {}]   ;;  %s398_s1 = inlined_call_operand.hbm [shape: f32[16,128], index: 1, kind: input, shape index: {}]   ;;  %s399_s2 = inlined_call_operand.vmem [shape: f32[1,128], index: 2, kind: input, shape index: {}]   ;;  %s400_s3 = inlined_call_operand.vmem [shape: f32[128,128], index: 3, kind: input, shape index: {}]   ;;  %s401_s4 = inlined_call_operand.vmem [shape: f32[1,128], index: 4, kind: input, shape index: {}]   ;;  %s402_s5 = inlined_call_operand.vmem [shape: f32[128,1], index: 5, kind: input, shape index: {}]   ;;  %s403_s6 = inlined_call_operand.<no memory space> [shape: f32[1,1], index: 6, kind: input, shape index: {}]   ;;  %s404_s7 = inlined_call_operand.vmem [shape: f32[8,1], index: 7, kind: output, shape index: {}]  }
   0x1   :  { %v12_v0 = vstv %s403_s6 }
   0x2   :  { %13 = vst [vmem:[#allocation2] sm:$0x1] %v12_v0 }
   0x3   :  { %14 = vsyncpa [#allocation4], 0  ;;  %s21_s28 = sshll.u32 %s397_s0, 4  ;;  %s22_s28 = int_to_ptr.hbm [resolvable:$true] %s21_s28 }
   0x4   :  { %15 = vsyncpa [#allocation6], 0  ;;  %s239_s29 = smov [#allocation3]   ;;  %s31_s10 = sshll.u32 %s398_s1, 4  ;;  %s32_s10 = int_to_ptr.hbm [resolvable:$true] %s31_s10 }
   0x5   :  { %s23_s30 = sshll.u32 %s239_s29, 4  ;;  %s240_s11 = smov [#allocation5]   ;;  %s24_s30 = int_to_ptr.vmem [resolvable:$true] %s23_s30 }
   0x6   :  { %26 = dma.hbm_to_vmem [thread:$0]  %s22_s28, 128, %s24_s30, [#allocation4]  }
   0x7   :  { %s33_s12 = sshll.u32 %s240_s11, 4  ;;  %s241_s6 = smov 128   ;;  %s34_s12 = int_to_ptr.vmem [resolvable:$true] %s33_s12 }
   0x8   :  { %s242_s13 = smov 8  }
   0x9   :  { %39 = dma.hbm_to_vmem [thread:$0]  %s32_s10, 256, %s34_s12, [#allocation6], %s241_s6, %s241_s6, %s242_s13  }
   0xa   :  { %235 = dma.done.wait [#allocation4], 128  }
   0xb   :  { %236 = vsyncadd [#allocation4], 4294967168 }
   0xc   :  { %237 = dma.done.wait [#allocation6], 256  }
   0xd   :  { %238 = vsyncadd [#allocation6], 4294967040  ;;  %v60_v1 = vld [vmem:[#allocation5 + $0x8] sm:$0xff]  ;;  %v59_v2 = vld [vmem:[#allocation5] sm:$0xff]  ;;  %vm65_vm0 = vcmask 130048   ;;  %vm171_vm1 = vcmask 7168  }
   0xe   :  { %83 = vmatpush.msra.mxu0 %v60_v1  ;;  %v58_v3 = vld [vmem:[#allocation3] sm:$0xff]  ;;  %v105_v4 = vld [vmem:[%s400_s3 + $0x78] sm:$0xff]  ;;  %v104_v5 = vld [vmem:[%s400_s3 + $0x70] sm:$0xff] }
   0xf   :  { %110 = vmatpush.msra.mxu1 %v105_v4  ;;  %v103_v6 = vld [vmem:[%s400_s3 + $0x68] sm:$0xff]  ;;  %v102_v7 = vld [vmem:[%s400_s3 + $0x60] sm:$0xff]  ;;  %v101_v8 = vld [vmem:[%s400_s3 + $0x58] sm:$0xff] }
  0x10   :  { %84 = vmatpush.msra.mxu0 %v59_v2  ;;  %v100_v9 = vld [vmem:[%s400_s3 + $0x50] sm:$0xff]  ;;  %v99_v10 = vld [vmem:[%s400_s3 + $0x48] sm:$0xff]  ;;  %v98_v11 = vld [vmem:[%s400_s3 + $0x40] sm:$0xff] }
  0x11   :  { %179 = vmatmul.msk.f32.vlgmr.msra.gmra.mxu0 %vm65_vm0, %v58_v3  ;;  %111 = vmatpush.msra.mxu1 %v104_v5  ;;  %v97_v12 = vld [vmem:[%s400_s3 + $0x38] sm:$0xff]  ;;  %v96_v13 = vld [vmem:[%s400_s3 + $0x30] sm:$0xff]  ;;  %v95_v14 = vld [vmem:[%s400_s3 + $0x28] sm:$0xff] }
  0x12   :  { %v94_v15 = vld [vmem:[%s400_s3 + $0x20] sm:$0xff]  ;;  %v93_v16 = vld [vmem:[%s400_s3 + $0x18] sm:$0xff]  ;;  %v92_v17 = vld [vmem:[%s400_s3 + $0x10] sm:$0xff] }
  0x13   :  { %112 = vmatpush.msra.mxu1 %v103_v6  ;;  %v91_v18 = vld [vmem:[%s400_s3 + $0x8] sm:$0xff]  ;;  %v90_v19 = vld [vmem:[%s400_s3] sm:$0xff]  ;;  %v146_v20 = vld [vmem:[%s402_s5 + $0x78] sm:$0xff] }
  0x14   :  { %v145_v21 = vld [vmem:[%s402_s5 + $0x70] sm:$0xff]  ;;  %151 = vmatpush.msra.mxu2 %v146_v20  ;;  %v144_v22 = vld [vmem:[%s402_s5 + $0x68] sm:$0xff]  ;;  %v143_v23 = vld [vmem:[%s402_s5 + $0x60] sm:$0xff] }
  0x15   :  { %113 = vmatpush.msra.mxu1 %v102_v7  ;;  %v142_v24 = vld [vmem:[%s402_s5 + $0x58] sm:$0xff]  ;;  %v141_v25 = vld [vmem:[%s402_s5 + $0x50] sm:$0xff]  ;;  %v140_v26 = vld [vmem:[%s402_s5 + $0x48] sm:$0xff] }
  0x16   :  { %152 = vmatpush.msra.mxu2 %v145_v21  ;;  %v139_v27 = vld [vmem:[%s402_s5 + $0x40] sm:$0xff]  ;;  %v138_v28 = vld [vmem:[%s402_s5 + $0x38] sm:$0xff]  ;;  %v137_v29 = vld [vmem:[%s402_s5 + $0x30] sm:$0xff] }
  0x17   :  { %114 = vmatpush.msra.mxu1 %v101_v8  ;;  %v136_v30 = vld [vmem:[%s402_s5 + $0x28] sm:$0xff]  ;;  %v135_v31 = vld [vmem:[%s402_s5 + $0x20] sm:$0xff]  ;;  %v134_v32 = vld [vmem:[%s402_s5 + $0x18] sm:$0xff] }
  0x18   :  { %153 = vmatpush.msra.mxu2 %v144_v22  ;;  %v184_v33 = vld [vmem:[%s399_s2] ss:$0 sm:$0xff]  ;;  %v133_v37 = vld [vmem:[%s402_s5 + $0x10] sm:$0xff]  ;;  %v132_v38 = vld [vmem:[%s402_s5 + $0x8] sm:$0xff] }
  0x19   :  { %115 = vmatpush.msra.mxu1 %v100_v9  ;;  %v131_v39 = vld [vmem:[%s402_s5] sm:$0xff] }
  0x1a   :  { %154 = vmatpush.msra.mxu2 %v143_v23  ;;  %v185_v40 = vld [vmem:[%s401_s4] ss:$0 sm:$0xff] }
  0x1b   :  { %116 = vmatpush.msra.mxu1 %v99_v10  ;;  %v186_v44 = vld [vmem:[#allocation2] ss:$0 sm:$0xff] }
  0x1c   :  { %155 = vmatpush.msra.mxu2 %v142_v24 }
  0x1d   :  { %117 = vmatpush.msra.mxu1 %v98_v11 }
  0x1e   :  { %156 = vmatpush.msra.mxu2 %v141_v25 }
  0x1f   :  { %118 = vmatpush.msra.mxu1 %v97_v12 }
  0x20   :  { %157 = vmatpush.msra.mxu2 %v140_v26 }
  0x21   :  { %119 = vmatpush.msra.mxu1 %v96_v13 }
  0x22   :  { %158 = vmatpush.msra.mxu2 %v139_v27 }
  0x23   :  { %120 = vmatpush.msra.mxu1 %v95_v14 }
  0x24   :  { %159 = vmatpush.msra.mxu2 %v138_v28 }
  0x25   :  { %121 = vmatpush.msra.mxu1 %v94_v15 }
  0x26   :  { %160 = vmatpush.msra.mxu2 %v137_v29 }
  0x27   :  { %122 = vmatpush.msra.mxu1 %v93_v16 }
  0x28   :  { %161 = vmatpush.msra.mxu2 %v136_v30 }
  0x29   :  { %123 = vmatpush.msra.mxu1 %v92_v17 }
  0x2a   :  { %162 = vmatpush.msra.mxu2 %v135_v31 }
  0x2b   :  { %124 = vmatpush.msra.mxu1 %v91_v18 }
  0x2c   :  { %163 = vmatpush.msra.mxu2 %v134_v32 }
  0x2d   :  { %125 = vmatpush.msra.mxu1 %v90_v19 }
  0x2e   :  { %164 = vmatpush.msra.mxu2 %v133_v37 }
  0x30   :  { %165 = vmatpush.msra.mxu2 %v132_v38 }
  0x32   :  { %166 = vmatpush.msra.mxu2 %v131_v39 }
  0x8e   :  { %v86_v34 = vpop.f32.mrf.mxu0 }
  0x8f   :  { %v87_v35 = vadd.f32 %v184_v33, %v86_v34 }
  0x91   :  { %v89_v36 = vmax.f32 %v87_v35, 0.0 }
  0x93   :  { %126 = vmatmul.f32.vlgmr.msra.gmra.mxu1 %v89_v36 }
 0x110   :  { %v127_v41 = vpop.f32.mrf.mxu1 }
 0x111   :  { %v128_v42 = vadd.f32 %v185_v40, %v127_v41 }
 0x113   :  { %v130_v43 = vmax.f32 %v128_v42, 0.0 }
 0x115   :  { %167 = vmatmul.f32.vlgmr.msra.gmra.mxu2 %v130_v43 }
 0x198   :  { %v168_v45 = vpop.f32.mrf.mxu2 }
 0x199   :  { %v169_v46 = vadd.f32 %v186_v44, %v168_v45 }
 0x19b   :  { %172 = vst.msk [vmem:[%s404_s7] sm:$0xff] %vm171_vm1, %v169_v46 }
 0x19c   :  { %177 = vsyncpa [#allocation4], 1 }
 0x19d   :  { %178 = vsyncpa [#allocation6], 1 }

</bundles_post_ra>
